<compile_context>
chip_gen: v6e
topology: v6e:2x2x1
jax: 0.10.0
libtpu: 0.0.40
codegen_flags: <defaults>
</compile_context>

<pallas_src>
import math

import jax
import jax.numpy as jnp
from jax.experimental import pallas as pl
from jax.experimental.pallas import tpu as pltpu


def _gelu_tanh(x):
    # BERT-style tanh-approx GELU:
    # 0.5 * x * (1 + tanh(sqrt(2/pi) * (x + 0.044715 * x^3)))
    c = math.sqrt(2.0 / math.pi)
    return 0.5 * x * (1.0 + jnp.tanh(c * (x + 0.044715 * x * x * x)))


def _round_up(a, b):
    return (a + b - 1) // b * b


def _pad2d(a, rows, cols):
    r, c = a.shape
    if r == rows and c == cols:
        return a
    return jnp.pad(a, ((0, rows - r), (0, cols - c)))


def ffn_kernel(x_ref, w1_ref, b1_ref, w2_ref, b2_ref, o_ref, acc_ref):
    # Grid: (row tiles [parallel], d_ff chunks [arbitrary / reduction]).
    j = pl.program_id(1)

    @pl.when(j == 0)
    def _init():
        acc_ref[...] = jnp.zeros_like(acc_ref)

    # First linear on this d_ff chunk: (tm, dm) @ (dm, tf) -> f32 on the MXU.
    # Operands stay in their native dtype (bf16 goes straight to the MXU).
    h = jnp.dot(x_ref[...], w1_ref[...], preferred_element_type=jnp.float32)
    h = h + b1_ref[...].astype(jnp.float32)  # (1, tf) broadcasts over rows

    # GELU (tanh approximation) in f32 on VPU/EUP.
    h = _gelu_tanh(h)

    # TODO(synk): dropout1 / dropout2 are identity in eval mode; training-mode
    # stochastic masking (pltpu.prng_*) is intentionally not applied here.

    # Second linear partial product: (tm, tf) @ (tf, dm), accumulated in f32.
    acc_ref[...] += jnp.dot(
        h.astype(w2_ref.dtype), w2_ref[...], preferred_element_type=jnp.float32
    )

    @pl.when(j == pl.num_programs(1) - 1)
    def _finalize():
        # Fold the (constant) b2 add into the epilogue only.
        o_ref[...] = (acc_ref[...] + b2_ref[...].astype(jnp.float32)).astype(
            o_ref.dtype
        )


def pointwise_ffn(x, w1, b1, w2, b2, *, tm=256, tf=512):
    """x: (batch, seq, d_model). w1: (d_model, d_ff), w2: (d_ff, d_model)."""
    batch, seq, d_model = x.shape
    d_ff = w1.shape[1]
    M = batch * seq

    # Minimum sublane tile depends on dtype: (16,128) for bf16, (8,128) for f32.
    sub = 16 if x.dtype == jnp.bfloat16 else 8

    # Lane-dense padding of the feature dims to multiples of 128.
    dm_pad = _round_up(d_model, 128)
    df_pad = _round_up(d_ff, 128)

    # Row tile: as large as requested, but clipped for tiny M and kept a
    # multiple of the dtype's sublane tile.
    tm = max(sub, min(tm, _round_up(M, sub)))
    tm = _round_up(tm, sub)
    M_pad = _round_up(M, tm)

    # d_ff chunk: multiple of 128, no larger than the (padded) d_ff, and the
    # padded d_ff must be an integer number of chunks.
    tf = _round_up(min(tf, df_pad), 128)
    df_pad = _round_up(df_pad, tf)

    # Zero padding contributes exactly 0 to the real outputs:
    #  - x cols / w1 rows padded with zeros  -> first matmul unchanged
    #  - w2 rows padded with zeros           -> padded hidden units contribute 0
    #  - w2 cols / b2 padded with zeros      -> padded output cols sliced off
    x2d = _pad2d(x.reshape(M, d_model), M_pad, dm_pad)
    w1_p = _pad2d(w1, dm_pad, df_pad)
    b1_p = _pad2d(b1.reshape(1, d_ff), 1, df_pad)
    w2_p = _pad2d(w2, df_pad, dm_pad)
    b2_p = _pad2d(b2.reshape(1, d_model), 1, dm_pad)

    grid = (M_pad // tm, df_pad // tf)

    x_itemsize = jnp.dtype(x.dtype).itemsize
    w_itemsize = jnp.dtype(w1.dtype).itemsize
    bytes_accessed = (
        x2d.size * x_itemsize
        + (w1_p.size + b1_p.size + w2_p.size + b2_p.size) * w_itemsize
        + M_pad * dm_pad * x_itemsize
    )
    cost = pl.CostEstimate(
        flops=4 * M * d_model * d_ff,
        transcendentals=M * d_ff,
        bytes_accessed=bytes_accessed,
    )

    out2d = pl.pallas_call(
        ffn_kernel,
        out_shape=jax.ShapeDtypeStruct((M_pad, dm_pad), x.dtype),
        grid_spec=pltpu.PrefetchScalarGridSpec(
            num_scalar_prefetch=0,
            grid=grid,
            in_specs=[
                pl.BlockSpec((tm, dm_pad), lambda i, j: (i, 0)),   # x row tile
                pl.BlockSpec((dm_pad, tf), lambda i, j: (0, j)),   # W1 chunk
                pl.BlockSpec((1, tf), lambda i, j: (0, j)),        # b1 chunk
                pl.BlockSpec((tf, dm_pad), lambda i, j: (j, 0)),   # W2 chunk
                pl.BlockSpec((1, dm_pad), lambda i, j: (0, 0)),    # b2 (resident)
            ],
            out_specs=pl.BlockSpec((tm, dm_pad), lambda i, j: (i, 0)),
            scratch_shapes=[pltpu.VMEM((tm, dm_pad), jnp.float32)],
        ),
        compiler_params=pltpu.CompilerParams(
            dimension_semantics=("parallel", "arbitrary"),
            vmem_limit_bytes=48 * 1024 * 1024,
        ),
        cost_estimate=cost,
    )(x2d, w1_p, b1_p, w2_p, b2_p)

    out2d = out2d[:M, :d_model]
    return out2d.reshape(batch, seq, d_model)


if __name__ == "__main__":
    # Small shapes consistent with the module: seq tokens of width d_model,
    # hidden expansion d_ff = 4 * d_model.
    batch, seq, d_model = 2, 8, 32
    d_ff = 4 * d_model  # 128

    key = jax.random.PRNGKey(0)
    kx, kw1, kb1, kw2, kb2 = jax.random.split(key, 5)

    x = jax.random.normal(kx, (batch, seq, d_model), dtype=jnp.float32)

    # Deterministic parameter init, matching nn.Linear's U(-1/sqrt(fan_in), +).
    bound1 = 1.0 / math.sqrt(d_model)
    bound2 = 1.0 / math.sqrt(d_ff)
    # Stored pre-transposed relative to PyTorch: W1 is (d_model, d_ff).
    w1 = jax.random.uniform(kw1, (d_model, d_ff), jnp.float32, -bound1, bound1)
    b1 = jax.random.uniform(kb1, (d_ff,), jnp.float32, -bound1, bound1)
    w2 = jax.random.uniform(kw2, (d_ff, d_model), jnp.float32, -bound2, bound2)
    b2 = jax.random.uniform(kb2, (d_model,), jnp.float32, -bound2, bound2)

    out = pointwise_ffn(x, w1, b1, w2, b2)
    out = jax.block_until_ready(out)

    # Pure-JAX reference for a sanity check.
    ref = _gelu_tanh(x @ w1 + b1) @ w2 + b2
    assert out.shape == (batch, seq, d_model)
    assert jnp.allclose(out, ref, atol=1e-5, rtol=1e-5)

    print("KERNEL_OK")
</pallas_src>

<mosaic_0001>
module attributes {stable_mosaic.version = 11 : i64} {
  func.func @ffn_kernel(%arg0: i32, %arg1: i32, %arg2: memref<16x128xf32, #tpu.memory_space<vmem>>, %arg3: memref<128x128xf32, #tpu.memory_space<vmem>>, %arg4: memref<1x128xf32, #tpu.memory_space<vmem>>, %arg5: memref<128x128xf32, #tpu.memory_space<vmem>>, %arg6: memref<1x128xf32, #tpu.memory_space<vmem>>, %arg7: memref<16x128xf32, #tpu.memory_space<vmem>>, %arg8: memref<16x128xf32, #tpu.memory_space<vmem>>) attributes {dimension_semantics = [#tpu.dimension_semantics<parallel>, #tpu.dimension_semantics<arbitrary>], iteration_bounds = array<i64: 1, 1>, scalar_prefetch = 0 : i64, scratch_operands = 1 : i64, tpu.core_type = #tpu.core_type<tc>, window_params = [{transform_indices = @transform_0, window_bounds = array<i64: 16, 128>}, {transform_indices = @transform_1, window_bounds = array<i64: 128, 128>}, {transform_indices = @transform_2, window_bounds = array<i64: 1, 128>}, {transform_indices = @transform_3, window_bounds = array<i64: 128, 128>}, {pipeline_mode = #tpu.pipeline_mode<synchronous>, transform_indices = @transform_4, window_bounds = array<i64: 1, 128>}, {transform_indices = @transform_5, window_bounds = array<i64: 16, 128>}]} {
    %c0_i32 = arith.constant 0 : i32
    %0 = arith.cmpi eq, %arg1, %c0_i32 : i32
    %1 = arith.extui %0 : i1 to i32
    %c0_i32_0 = arith.constant 0 : i32
    %2 = arith.cmpi ne, %1, %c0_i32_0 : i32
    scf.if %2 {
      %cst_19 = arith.constant 0.000000e+00 : f32
      %30 = vector.broadcast %cst_19 : f32 to vector<16x128xf32>
      %c0_20 = arith.constant 0 : index
      %c0_21 = arith.constant 0 : index
      %31 = vector.load %arg8[%c0_20, %c0_21] : memref<16x128xf32, #tpu.memory_space<vmem>>, vector<16x128xf32>
      tpu.vector_store %arg8[%c0_20, %c0_21], %30 {strides = array<i32>} : memref<16x128xf32, #tpu.memory_space<vmem>>, vector<16x128xf32>,
    } else {
    }
    %c0 = arith.constant 0 : index
    %c0_1 = arith.constant 0 : index
    %3 = vector.load %arg2[%c0, %c0_1] : memref<16x128xf32, #tpu.memory_space<vmem>>, vector<16x128xf32>
    %c0_2 = arith.constant 0 : index
    %c0_3 = arith.constant 0 : index
    %4 = vector.load %arg3[%c0_2, %c0_3] : memref<128x128xf32, #tpu.memory_space<vmem>>, vector<128x128xf32>
    %cst = arith.constant dense<0.000000e+00> : vector<16x128xf32>
    %5 = tpu.matmul %3, %4, %cst {dimension_numbers = #tpu.dot_dimension_numbers<[1], [0], [0], [1], [0, 0, 1, 1], [], []>} : vector<16x128xf32>, vector<128x128xf32>, vector<16x128xf32> -> vector<16x128xf32>
    %c0_4 = arith.constant 0 : index
    %c0_5 = arith.constant 0 : index
    %6 = vector.load %arg4[%c0_4, %c0_5] : memref<1x128xf32, #tpu.memory_space<vmem>>, vector<1x128xf32>
    %7 = vector.broadcast %6 : vector<1x128xf32> to vector<16x128xf32>
    %8 = arith.addf %5, %7 : vector<16x128xf32>
    %cst_6 = arith.constant 5.000000e-01 : f32
    %9 = vector.broadcast %cst_6 : f32 to vector<16x128xf32>
    %10 = arith.mulf %9, %8 : vector<16x128xf32>
    %cst_7 = arith.constant 4.471500e-02 : f32
    %11 = vector.broadcast %cst_7 : f32 to vector<16x128xf32>
    %12 = arith.mulf %11, %8 : vector<16x128xf32>
    %13 = arith.mulf %12, %8 : vector<16x128xf32>
    %14 = arith.mulf %13, %8 : vector<16x128xf32>
    %15 = arith.addf %8, %14 : vector<16x128xf32>
    %cst_8 = arith.constant 0.797884583 : f32
    %16 = vector.broadcast %cst_8 : f32 to vector<16x128xf32>
    %17 = arith.mulf %16, %15 : vector<16x128xf32>
    %18 = math.tanh %17 : vector<16x128xf32>
    %cst_9 = arith.constant 1.000000e+00 : f32
    %19 = vector.broadcast %cst_9 : f32 to vector<16x128xf32>
    %20 = arith.addf %19, %18 : vector<16x128xf32>
    %21 = arith.mulf %10, %20 : vector<16x128xf32>
    %c0_10 = arith.constant 0 : index
    %c0_11 = arith.constant 0 : index
    %22 = vector.load %arg8[%c0_10, %c0_11] : memref<16x128xf32, #tpu.memory_space<vmem>>, vector<16x128xf32>
    %c0_12 = arith.constant 0 : index
    %c0_13 = arith.constant 0 : index
    %23 = vector.load %arg5[%c0_12, %c0_13] : memref<128x128xf32, #tpu.memory_space<vmem>>, vector<128x128xf32>
    %cst_14 = arith.constant dense<0.000000e+00> : vector<16x128xf32>
    %24 = tpu.matmul %21, %23, %cst_14 {dimension_numbers = #tpu.dot_dimension_numbers<[1], [0], [0], [1], [0, 0, 1, 1], [], []>} : vector<16x128xf32>, vector<128x128xf32>, vector<16x128xf32> -> vector<16x128xf32>
    %25 = arith.addf %22, %24 : vector<16x128xf32>
    %c0_15 = arith.constant 0 : index
    %c0_16 = arith.constant 0 : index
    %26 = vector.load %arg8[%c0_15, %c0_16] : memref<16x128xf32, #tpu.memory_space<vmem>>, vector<16x128xf32>
    tpu.vector_store %arg8[%c0_15, %c0_16], %25 {strides = array<i32>} : memref<16x128xf32, #tpu.memory_space<vmem>>, vector<16x128xf32>,
    %c0_i32_17 = arith.constant 0 : i32
    %27 = arith.cmpi eq, %arg1, %c0_i32_17 : i32
    %28 = arith.extui %27 : i1 to i32
    %c0_i32_18 = arith.constant 0 : i32
    %29 = arith.cmpi ne, %28, %c0_i32_18 : i32
    scf.if %29 {
      %c0_19 = arith.constant 0 : index
      %c0_20 = arith.constant 0 : index
      %30 = vector.load %arg8[%c0_19, %c0_20] : memref<16x128xf32, #tpu.memory_space<vmem>>, vector<16x128xf32>
      %c0_21 = arith.constant 0 : index
      %c0_22 = arith.constant 0 : index
      %31 = vector.load %arg6[%c0_21, %c0_22] : memref<1x128xf32, #tpu.memory_space<vmem>>, vector<1x128xf32>
      %32 = vector.broadcast %31 : vector<1x128xf32> to vector<16x128xf32>
      %33 = arith.addf %30, %32 : vector<16x128xf32>
      %c0_23 = arith.constant 0 : index
      %c0_24 = arith.constant 0 : index
      %34 = vector.load %arg7[%c0_23, %c0_24] : memref<16x128xf32, #tpu.memory_space<vmem>>, vector<16x128xf32>
      tpu.vector_store %arg7[%c0_23, %c0_24], %33 {strides = array<i32>} : memref<16x128xf32, #tpu.memory_space<vmem>>, vector<16x128xf32>,
    } else {
    }
    return
  }
  func.func @transform_0(%arg0: i32, %arg1: i32) -> (i32, i32) {
    %c0_i32 = arith.constant 0 : i32
    %c0_i32_0 = arith.constant 0 : i32
    return %arg0, %c0_i32 : i32, i32
  }
  func.func @transform_1(%arg0: i32, %arg1: i32) -> (i32, i32) {
    %c0_i32 = arith.constant 0 : i32
    %c0_i32_0 = arith.constant 0 : i32
    return %c0_i32, %arg1 : i32, i32
  }
  func.func @transform_2(%arg0: i32, %arg1: i32) -> (i32, i32) {
    %c0_i32 = arith.constant 0 : i32
    %c0_i32_0 = arith.constant 0 : i32
    return %c0_i32, %arg1 : i32, i32
  }
  func.func @transform_3(%arg0: i32, %arg1: i32) -> (i32, i32) {
    %c0_i32 = arith.constant 0 : i32
    %c0_i32_0 = arith.constant 0 : i32
    return %arg1, %c0_i32 : i32, i32
  }
  func.func @transform_4(%arg0: i32, %arg1: i32) -> (i32, i32) {
    %c0_i32 = arith.constant 0 : i32
    %c0_i32_0 = arith.constant 0 : i32
    %c0_i32_1 = arith.constant 0 : i32
    return %c0_i32, %c0_i32_0 : i32, i32
  }
  func.func @transform_5(%arg0: i32, %arg1: i32) -> (i32, i32) {
    %c0_i32 = arith.constant 0 : i32
    %c0_i32_0 = arith.constant 0 : i32
    return %arg0, %c0_i32 : i32, i32
  }
}

</mosaic_0001>

<bundles_post_ra>
// kernel: tpu_custom_call.1
= control target key start
LH: loop header
LB: loop body
LE: loop exit
PB: predicated region body
PF: predicated region fallthrough
CT: control target
= control target key end

     0   :  { %10 = vsyncpa [#allocation4], 0  ;;  %s587_s0 = inlined_call_operand.hbm [shape: f32[16,128], index: 0, kind: input, shape index: {}]   ;;  %s588_s1 = inlined_call_operand.hbm [shape: f32[128,128], index: 1, kind: input, shape index: {}]   ;;  %s589_s2 = inlined_call_operand.vmem [shape: f32[1,128], index: 2, kind: input, shape index: {}]   ;;  %s590_s3 = inlined_call_operand.hbm [shape: f32[128,128], index: 3, kind: input, shape index: {}]   ;;  %s591_s4 = inlined_call_operand.vmem [shape: f32[1,128], index: 4, kind: input, shape index: {}]   ;;  %s592_s5 = inlined_call_operand.hbm [shape: f32[16,128], index: 5, kind: output, shape index: {}]  }
   0x1   :  { %11 = vsyncpa [#allocation7], 0 }
   0x2   :  { %12 = vsyncpa [#allocation5], 0  ;;  %s521_s18 = smov [#allocation6]   ;;  %s522_s20 = smov [#allocation3]  }
   0x3   :  { %s30_s19 = sshll.u32 %s521_s18, 4  ;;  %s18_s21 = sshll.u32 %s522_s20, 4  ;;  %s31_s19 = int_to_ptr.vmem [resolvable:$true] %s30_s19  ;;  %s19_s21 = int_to_ptr.vmem [resolvable:$true] %s18_s21 }
   0x4   :  { %s443_s22 = scalar_lea.vmem %s31_s19, 2048  ;;  %p448_p1 = scmp.lt.s32.totalorder %s31_s19, %s31_s19 }
   0x5   :  { %p444_p0 = scmp.ne.s32.totalorder %s31_s19, %s443_s22  ;;  %p449_p2 = scmp.lt.s32.totalorder %s443_s22, %s443_s22 }
   0x7   :  { %p450_p3 = por %p449_p2, %p448_p1 }
   0x9   :  { %p451_p4 = pnand %p450_p3, %p444_p0 }
   0xb   :  { %454 = shalt.err (!%p451_p4)
}
   0xc   :  { %s523_s23 = smov 128   ;;  %s524_s24 = smov 8  }
   0xd   :  { %36 = dma.hbm_to_vmem [thread:$0]  %s588_s1, 2048, %s31_s19, [#allocation7], %s523_s23, %s523_s23, %s524_s24  }
   0xe   :  { %s463_s27 = scalar_lea.vmem %s19_s21, 256  ;;  %p468_p6 = scmp.lt.s32.totalorder %s19_s21, %s19_s21 }
   0xf   :  { %p464_p5 = scmp.ne.s32.totalorder %s19_s21, %s463_s27  ;;  %p469_p7 = scmp.lt.s32.totalorder %s463_s27, %s463_s27 }
  0x11   :  { %p470_p8 = por %p469_p7, %p468_p6 }
  0x13   :  { %p471_p9 = pnand %p470_p8, %p464_p5 }
  0x15   :  { %474 = shalt.err (!%p471_p9)
}
  0x16   :  { %24 = dma.hbm_to_vmem [thread:$0]  %s587_s0, 256, %s19_s21, [#allocation4], %s523_s23, %s523_s23, %s524_s24  }
  0x17   :  { %s525_s30 = smov [#allocation8]  }
  0x18   :  { %s44_s6 = sshll.u32 %s525_s30, 4  ;;  %s45_s6 = int_to_ptr.vmem [resolvable:$true] %s44_s6 }
  0x19   :  { %s483_s7 = scalar_lea.vmem %s45_s6, 2048  ;;  %p488_p11 = scmp.lt.s32.totalorder %s45_s6, %s45_s6 }
  0x1a   :  { %p484_p10 = scmp.ne.s32.totalorder %s45_s6, %s483_s7  ;;  %p489_p12 = scmp.lt.s32.totalorder %s483_s7, %s483_s7 }
  0x1c   :  { %p490_p13 = por %p489_p12, %p488_p11 }
  0x1e   :  { %p491_p0 = pnand %p490_p13, %p484_p10 }
  0x20   :  { %494 = shalt.err (!%p491_p0)
}
  0x21   :  { %50 = dma.hbm_to_vmem [thread:$0]  %s590_s3, 2048, %s45_s6, [#allocation7], %s523_s23, %s523_s23, %s524_s24  }
  0x22   :  { %515 = dma.done.wait [#allocation4], 256  }
  0x23   :  { %516 = vsyncadd [#allocation4], 4294967040 }
  0x24   :  { %517 = dma.done.wait [#allocation7], 4096  }
  0x25   :  { %518 = vsyncadd [#allocation7], 4294963200  ;;  %v85_v0 = vld [vmem:[#allocation6 + $0x78] sm:$0xff]  ;;  %v84_v1 = vld [vmem:[#allocation6 + $0x70] sm:$0xff]  ;;  %s526_s10 = smov [#allocation9]  }
  0x26   :  { %355 = vmatprep.subr.mxu0 %v85_v0  ;;  %v83_v2 = vld [vmem:[#allocation6 + $0x68] sm:$0xff]  ;;  %v82_v3 = vld [vmem:[#allocation6 + $0x60] sm:$0xff]  ;;  %v68_v4 = vld [vmem:[#allocation3] sm:$0xff]  ;;  %s304_s11 = sshll.u32 %s526_s10, 4  ;;  %s305_s11 = int_to_ptr.vmem [resolvable:$true] %s304_s11 }
  0x27   :  { %356 = vmatpush3.msra.mxu0 %v85_v0  ;;  %v81_v5 = vld [vmem:[#allocation6 + $0x58] sm:$0xff]  ;;  %387 = vmatprep.mubr.f32.mxu0 %v68_v4  ;;  %v80_v6 = vld [vmem:[#allocation6 + $0x50] sm:$0xff]  ;;  %v79_v7 = vld [vmem:[#allocation6 + $0x48] sm:$0xff]  ;;  %s495_s12 = scalar_lea.vmem %s305_s11, 256  ;;  %p500_p2 = scmp.lt.s32.totalorder %s305_s11, %s305_s11 }
  0x28   :  { %357 = vmatprep.subr.mxu0 %v84_v1  ;;  %v78_v8 = vld [vmem:[#allocation6 + $0x40] sm:$0xff]  ;;  %v77_v9 = vld [vmem:[#allocation6 + $0x38] sm:$0xff]  ;;  %v76_v10 = vld [vmem:[#allocation6 + $0x30] sm:$0xff]  ;;  %p496_p1 = scmp.ne.s32.totalorder %s305_s11, %s495_s12  ;;  %p501_p3 = scmp.lt.s32.totalorder %s495_s12, %s495_s12 }
  0x29   :  { %358 = vmatpush3.msra.mxu0 %v84_v1  ;;  %v75_v11 = vld [vmem:[#allocation6 + $0x28] sm:$0xff]  ;;  %v74_v12 = vld [vmem:[#allocation6 + $0x20] sm:$0xff]  ;;  %v73_v13 = vld [vmem:[#allocation6 + $0x18] sm:$0xff] }
  0x2a   :  { %359 = vmatprep.subr.mxu0 %v83_v2  ;;  %v72_v14 = vld [vmem:[#allocation6 + $0x10] sm:$0xff]  ;;  %v71_v15 = vld [vmem:[#allocation6 + $0x8] sm:$0xff]  ;;  %v70_v16 = vld [vmem:[#allocation6] sm:$0xff]  ;;  %p502_p4 = por %p501_p3, %p500_p2 }
  0x2b   :  { %360 = vmatpush3.msra.mxu0 %v83_v2  ;;  %v69_v17 = vld [vmem:[#allocation3 + $0x8] sm:$0xff]  ;;  %v202_v19 = vld [vmem:[#allocation8 + $0x70] sm:$0xff]  ;;  %v201_v20 = vld [vmem:[#allocation8 + $0x68] sm:$0xff] }
  0x2c   :  { %361 = vmatprep.subr.mxu0 %v82_v3  ;;  %v203_v18 = vld [vmem:[#allocation8 + $0x78] sm:$0xff]  ;;  %v200_v21 = vld [vmem:[#allocation8 + $0x60] sm:$0xff]  ;;  %v198_v23 = vld [vmem:[#allocation8 + $0x50] sm:$0xff]  ;;  %p503_p5 = pnand %p502_p4, %p496_p1 }
  0x2d   :  { %362 = vmatpush3.msra.mxu0 %v82_v3  ;;  %390 = vmatprep.subr.mxu1 %v203_v18  ;;  %v199_v22 = vld [vmem:[#allocation8 + $0x58] sm:$0xff]  ;;  %v197_v24 = vld [vmem:[#allocation8 + $0x48] sm:$0xff]  ;;  %v196_v25 = vld [vmem:[#allocation8 + $0x40] sm:$0xff] }
  0x2e   :  { %363 = vmatprep.subr.mxu0 %v81_v5  ;;  %391 = vmatpush3.msra.mxu1 %v203_v18  ;;  %v195_v26 = vld [vmem:[#allocation8 + $0x38] sm:$0xff]  ;;  %v194_v27 = vld [vmem:[#allocation8 + $0x30] sm:$0xff]  ;;  %v193_v28 = vld [vmem:[#allocation8 + $0x28] sm:$0xff] }
  0x2f   :  { %364 = vmatpush3.msra.mxu0 %v81_v5  ;;  %392 = vmatprep.subr.mxu1 %v202_v19  ;;  %v192_v29 = vld [vmem:[#allocation8 + $0x20] sm:$0xff]  ;;  %v191_v30 = vld [vmem:[#allocation8 + $0x18] sm:$0xff]  ;;  %v190_v31 = vld [vmem:[#allocation8 + $0x10] sm:$0xff] }
  0x30   :  { %365 = vmatprep.subr.mxu0 %v80_v6  ;;  %393 = vmatpush3.msra.mxu1 %v202_v19  ;;  %v189_v32 = vld [vmem:[#allocation8 + $0x8] sm:$0xff]  ;;  %v188_v33 = vld [vmem:[#allocation8] sm:$0xff]  ;;  %v317_v34 = vld [vmem:[%s589_s2] ss:$0 sm:$0xff] }
  0x31   :  { %366 = vmatpush3.msra.mxu0 %v80_v6  ;;  %394 = vmatprep.subr.mxu1 %v201_v20  ;;  %v318_v57 = vld [vmem:[%s591_s4] ss:$0 sm:$0xff] }
  0x32   :  { %367 = vmatprep.subr.mxu0 %v79_v7  ;;  %395 = vmatpush3.msra.mxu1 %v201_v20 }
  0x33   :  { %368 = vmatpush3.msra.mxu0 %v79_v7  ;;  %396 = vmatprep.subr.mxu1 %v200_v21 }
  0x34   :  { %369 = vmatprep.subr.mxu0 %v78_v8  ;;  %397 = vmatpush3.msra.mxu1 %v200_v21 }
  0x35   :  { %370 = vmatpush3.msra.mxu0 %v78_v8  ;;  %398 = vmatprep.subr.mxu1 %v199_v22 }
  0x36   :  { %371 = vmatprep.subr.mxu0 %v77_v9  ;;  %399 = vmatpush3.msra.mxu1 %v199_v22 }
  0x37   :  { %372 = vmatpush3.msra.mxu0 %v77_v9  ;;  %400 = vmatprep.subr.mxu1 %v198_v23 }
  0x38   :  { %373 = vmatprep.subr.mxu0 %v76_v10  ;;  %401 = vmatpush3.msra.mxu1 %v198_v23 }
  0x39   :  { %374 = vmatpush3.msra.mxu0 %v76_v10  ;;  %402 = vmatprep.subr.mxu1 %v197_v24 }
  0x3a   :  { %375 = vmatprep.subr.mxu0 %v75_v11  ;;  %403 = vmatpush3.msra.mxu1 %v197_v24 }
  0x3b   :  { %376 = vmatpush3.msra.mxu0 %v75_v11  ;;  %404 = vmatprep.subr.mxu1 %v196_v25 }
  0x3c   :  { %377 = vmatprep.subr.mxu0 %v74_v12  ;;  %405 = vmatpush3.msra.mxu1 %v196_v25 }
  0x3d   :  { %378 = vmatpush3.msra.mxu0 %v74_v12  ;;  %406 = vmatprep.subr.mxu1 %v195_v26 }
  0x3e   :  { %379 = vmatprep.subr.mxu0 %v73_v13  ;;  %407 = vmatpush3.msra.mxu1 %v195_v26 }
  0x3f   :  { %380 = vmatpush3.msra.mxu0 %v73_v13  ;;  %408 = vmatprep.subr.mxu1 %v194_v27 }
  0x40   :  { %381 = vmatprep.subr.mxu0 %v72_v14  ;;  %409 = vmatpush3.msra.mxu1 %v194_v27 }
  0x41   :  { %382 = vmatpush3.msra.mxu0 %v72_v14  ;;  %410 = vmatprep.subr.mxu1 %v193_v28 }
  0x42   :  { %383 = vmatprep.subr.mxu0 %v71_v15  ;;  %411 = vmatpush3.msra.mxu1 %v193_v28 }
  0x43   :  { %384 = vmatpush3.msra.mxu0 %v71_v15  ;;  %412 = vmatprep.subr.mxu1 %v192_v29 }
  0x44   :  { %385 = vmatprep.subr.mxu0 %v70_v16  ;;  %413 = vmatpush3.msra.mxu1 %v192_v29 }
  0x45   :  { %386 = vmatpush3.msra.mxu0 %v70_v16  ;;  %414 = vmatprep.subr.mxu1 %v191_v30 }
  0x46   :  { %388 = vmatmul.mubr.f32.vlgmr.msra.gmra.mxu0 %v69_v17  ;;  %415 = vmatpush3.msra.mxu1 %v191_v30 }
  0x47   :  { %416 = vmatprep.subr.mxu1 %v190_v31 }
  0x48   :  { %417 = vmatpush3.msra.mxu1 %v190_v31 }
  0x49   :  { %418 = vmatprep.subr.mxu1 %v189_v32 }
  0x4a   :  { %419 = vmatpush3.msra.mxu1 %v189_v32 }
  0x4b   :  { %420 = vmatprep.subr.mxu1 %v188_v33 }
  0x4c   :  { %421 = vmatpush3.msra.mxu1 %v188_v33 }
 0x106   :  { %v389_v35 = vpop.f32.mrf.mxu0 }
 0x107   :  { %v165_v36 = vadd.f32 %v389_v35, %v317_v34 }
 0x108   :  { %v159_v37 = vpop.f32.mrf.mxu0 }
 0x109   :  { %v171_v38 = vmul.f32 0.044715, %v165_v36  ;;  %v160_v39 = vadd.f32 %v317_v34, %v159_v37  ;;  %v169_v54 = vmul.f32 0.5, %v165_v36 }
 0x10b   :  { %v173_v40 = vmul.f32 %v171_v38, %v165_v36  ;;  %v170_v41 = vmul.f32 0.044715, %v160_v39  ;;  %v168_v52 = vmul.f32 0.5, %v160_v39 }
 0x10d   :  { %v172_v42 = vmul.f32 %v170_v41, %v160_v39  ;;  %v175_v43 = vmul.f32 %v173_v40, %v165_v36 }
 0x10f   :  { %v174_v44 = vmul.f32 %v172_v42, %v160_v39  ;;  %v177_v45 = vadd.f32 %v175_v43, %v165_v36 }
 0x111   :  { %v176_v46 = vadd.f32 %v174_v44, %v160_v39  ;;  %v179_v47 = vmul.f32 0.7978846, %v177_v45 }
 0x113   :  { %v178_v48 = vmul.f32 0.7978846, %v176_v46  ;;  %431 = vtanh.f32 %v179_v47 }
 0x115   :  { %433 = vtanh.f32 %v178_v48 }
 0x120   :  { %v432_v49 = vpop.eup %431 }
 0x121   :  { %v183_v51 = vadd.f32 1.0, %v432_v49 }
 0x122   :  { %v434_v50 = vpop.eup %433 }
 0x123   :  { %v182_v53 = vadd.f32 1.0, %v434_v50  ;;  %v185_v56 = vmul.f32 %v183_v51, %v169_v54 }
 0x125   :  { %v184_v55 = vmul.f32 %v182_v53, %v168_v52 }
 0x127   :  { %422 = vmatprep.mubr.f32.mxu1 %v184_v55 }
 0x128   :  { %423 = vmatmul.mubr.f32.vlgmr.msra.gmra.mxu1 %v185_v56 }
 0x1e8   :  { %v424_v58 = vpop.f32.mrf.mxu1 }
 0x1e9   :  { %v296_v59 = vadd.f32 %v424_v58, %v318_v57 }
 0x1ea   :  { %v270_v60 = vpop.f32.mrf.mxu1 }
 0x1eb   :  { %298 = vst [vmem:[#allocation9 + $0x8] sm:$0xff] %v296_v59  ;;  %v295_v61 = vadd.f32 %v318_v57, %v270_v60 }
 0x1ed   :  { %297 = vst [vmem:[#allocation9] sm:$0xff] %v295_v61 }
 0x1ee   :  { %506 = shalt.err (!%p503_p5)
}
 0x1ef   :  { %310 = dma.vmem_to_hbm [thread:$0]  %s305_s11, 256, %s592_s5, [#allocation5], %s523_s23, %s523_s23, %s524_s24  }
 0x1f0   :  { %519 = dma.done.wait [#allocation5], 256  }
 0x1f1   :  { %520 = vsyncadd [#allocation5], 4294967040 }
 0x1f2   :  { %314 = vsyncpa [#allocation4], 1 }
 0x1f3   :  { %315 = vsyncpa [#allocation7], 1 }
 0x1f4   :  { %316 = vsyncpa [#allocation5], 1 }

</bundles_post_ra>
